<compile_context>
chip_gen: v5e
topology: v5e:2x2
jax: 0.10.0
libtpu: 0.0.40
codegen_flags: <defaults>
</compile_context>

<pallas_src>
import functools

import jax
import jax.numpy as jnp
from jax import lax
from jax.experimental import pallas as pl
from jax.experimental.pallas import tpu as pltpu

_VMEM_LIMIT_BYTES = 48 * 1024 * 1024   # safe on v5e/v6e (128 MiB) and v7x (64 MiB)


# --------------------------------------------------------------------------- #
# Stage 1: tiled stats pass -> bandwidth scalar + per-row squared norms.      #
# --------------------------------------------------------------------------- #
def _mmd_stats_kernel(z_ref, bw_ref, sq_ref, tot_ref, colsum_ref, *,
                      n_rows, n1, n2, kernel_mul, kernel_num):
    i = pl.program_id(0)

    z = z_ref[...].astype(jnp.float32)                      # (TMs, D)
    row_sq = jnp.sum(z * z, axis=1, keepdims=True)          # (TMs, 1)
    sq_ref[...] = row_sq                                    # per-row ||zi||^2

    @pl.when(i == 0)
    def _():
        tot_ref[0] = jnp.float32(0.0)
        colsum_ref[...] = jnp.zeros_like(colsum_ref)

    tot_ref[0] = tot_ref[0] + jnp.sum(row_sq)
    colsum_ref[...] = colsum_ref[...] + jnp.sum(z, axis=0, keepdims=True)

    @pl.when(i == pl.num_programs(0) - 1)
    def _():
        colsum = colsum_ref[...]
        # Closed form for sum_ij ||zi - zj||^2.  TODO(synk): center z by its
        # column mean (distance-invariant) to avoid f32 cancellation for
        # strongly un-centered embeddings; the epsilon clamp below prevents a
        # negative/zero bandwidth from flipping the exp sign.
        sum_l2 = (2.0 * float(n_rows) * tot_ref[0]
                  - 2.0 * jnp.sum(colsum * colsum))
        n_samples = n1 + n2
        bw = sum_l2 / float(n_samples * n_samples - n_samples)
        bw = bw / (kernel_mul ** (kernel_num // 2))
        bw_ref[0, 0] = jnp.maximum(bw, jnp.float32(1e-12))


# --------------------------------------------------------------------------- #
# Stage 2: tiled pairwise Gaussian-kernel matrix + region sums.               #
# --------------------------------------------------------------------------- #
def _mmd_tile_kernel(bw_ref, sqr_ref, sqc_ref, zi_ref, zj_ref, out_ref, acc_ref, *,
                     batch_size, kernel_mul, kernel_num,
                     tile_m, tile_n, use_bf16_gram):
    i = pl.program_id(0)
    j = pl.program_id(1)
    nj = pl.num_programs(1)

    # Per-row-tile accumulators (XX, YY, XY, YX); reset at the start of each
    # column sweep so the row grid axis can be "parallel" (megacore on v7x).
    @pl.when(j == 0)
    def _():
        acc_ref[0] = jnp.float32(0.0)
        acc_ref[1] = jnp.float32(0.0)
        acc_ref[2] = jnp.float32(0.0)
        acc_ref[3] = jnp.float32(0.0)

    if use_bf16_gram:
        gi = zi_ref[...].astype(jnp.bfloat16)
        gj = zj_ref[...].astype(jnp.bfloat16)
    else:
        gi = zi_ref[...].astype(jnp.float32)
        gj = zj_ref[...].astype(jnp.float32)
    gram = lax.dot_general(gi, gj, (((1,), (1,)), ((), ())),
                           preferred_element_type=jnp.float32)     # (TM, TN)

    # Precomputed squared norms: (TM,1) rows, (1,TN) columns (pre-transposed
    # in the wrapper -> no per-tile XLU relayout).  Clamp rounding negatives.
    l2 = jnp.maximum(sqr_ref[...] + sqc_ref[...] - 2.0 * gram, 0.0)

    bw = bw_ref[0, 0]
    if kernel_mul == 2.0:
        # One exp() with the LARGEST bandwidth; the other kernels come from
        # repeated squaring on the VPU (ulp error grows ~2^k, negligible here).
        neg_inv = -1.0 / (bw * (kernel_mul ** (kernel_num - 1)))
        e = jnp.exp(l2 * neg_inv)
        ksum = e
        t = e
        for _ in range(kernel_num - 1):
            t = t * t
            ksum = ksum + t
    else:
        ksum = jnp.zeros_like(l2)
        for k in range(kernel_num):
            neg_inv = -1.0 / (bw * (kernel_mul ** k))
            ksum = ksum + jnp.exp(l2 * neg_inv)

    # ---- region sums -------------------------------------------------------
    row_lo = i * tile_m
    col_lo = j * tile_n
    row_all_x = (row_lo + tile_m) <= batch_size
    row_all_y = row_lo >= batch_size
    col_all_x = (col_lo + tile_n) <= batch_size
    col_all_y = col_lo >= batch_size
    uniform = (row_all_x | row_all_y) & (col_all_x | col_all_y)

    # Fast path: the tile lies entirely in one region -> one reduction, a few
    # scalar selects, no iota / masks.  This is every tile except (at most)
    # one boundary-straddling row/column of tiles.
    @pl.when(uniform)
    def _():
        total = jnp.sum(ksum)
        acc_ref[0] = acc_ref[0] + jnp.where(row_all_x & col_all_x, total, 0.0)
        acc_ref[1] = acc_ref[1] + jnp.where(row_all_y & col_all_y, total, 0.0)
        acc_ref[2] = acc_ref[2] + jnp.where(row_all_x & col_all_y, total, 0.0)
        acc_ref[3] = acc_ref[3] + jnp.where(row_all_y & col_all_x, total, 0.0)

    # Slow path: the source/target boundary cuts through this tile.
    @pl.when(jnp.logical_not(uniform))
    def _():
        col_ids = col_lo + lax.broadcasted_iota(jnp.int32, (tile_m, tile_n), 1)
        row_sum = jnp.sum(ksum, axis=1, keepdims=True)                 # (TM,1)
        row_sum_x = jnp.sum(jnp.where(col_ids < batch_size, ksum, 0.0),
                            axis=1, keepdims=True)
        row_sum_y = row_sum - row_sum_x
        row_in_x = (row_lo + lax.broadcasted_iota(jnp.int32, (tile_m, 1), 0)
                    ) < batch_size
        acc_ref[0] = acc_ref[0] + jnp.sum(jnp.where(row_in_x, row_sum_x, 0.0))
        acc_ref[2] = acc_ref[2] + jnp.sum(jnp.where(row_in_x, row_sum_y, 0.0))
        acc_ref[3] = acc_ref[3] + jnp.sum(jnp.where(row_in_x, 0.0, row_sum_x))
        acc_ref[1] = acc_ref[1] + jnp.sum(jnp.where(row_in_x, 0.0, row_sum_y))

    # Emit this row-tile's partials at the end of its column sweep.  Output is
    # lane-padded to (8,128) so the store is a full, unmasked vreg tile.
    @pl.when(j == nj - 1)
    def _():
        lane = lax.broadcasted_iota(jnp.int32, (8, 128), 1)
        sub = lax.broadcasted_iota(jnp.int32, (8, 128), 0)
        row0 = sub == 0
        vals = jnp.where(row0 & (lane == 0), acc_ref[0],
               jnp.where(row0 & (lane == 1), acc_ref[1],
               jnp.where(row0 & (lane == 2), acc_ref[2],
               jnp.where(row0 & (lane == 3), acc_ref[3],
                         jnp.float32(0.0)))))
        out_ref[0] = vals


# --------------------------------------------------------------------------- #
# Tile-size selection (budgeted against v7x's 64 MiB physical VMEM).          #
# --------------------------------------------------------------------------- #
def _pick_stats_tile(n_rows, d, itemsize, budget_bytes=24 * 1024 * 1024):
    cands = [c for c in (512, 256, 128) if n_rows % c == 0]
    if not cands:
        return n_rows
    for c in cands:
        if 2 * c * d * itemsize <= budget_bytes:
            return c
    return cands[-1]


def _pick_tiles(n_rows, d, itemsize, budget_bytes=40 * 1024 * 1024):
    cands = [c for c in (512, 256, 128) if n_rows % c == 0]
    if not cands:
        # TODO(synk): pad N to a multiple of 128 for very large, prime-ish N.
        return n_rows, n_rows
    for tm in cands:                      # prefer larger TM (fewer passes over z)
        for tn in cands:
            if tn > tm:
                continue
            est = 2 * (tm + tn) * d * itemsize + 5 * tm * tn * 4
            if est <= budget_bytes:
                return tm, tn
    return cands[-1], cands[-1]


def mmd_loss(source, target, n1=None, n2=None, *, kernel_mul=2.0, kernel_num=5,
             block_m=None, block_n=None, use_bf16_gram=None):
    """Pallas TPU implementation of MMD_loss.forward."""
    if n1 is None and n2 is None:
        n1 = int(source.shape[0])
        n2 = int(target.shape[0])
    # NOTE: as in the PyTorch module, overriding n1/n2 only changes the
    # normalizers; the X/Y partition always uses source.shape[0].
    batch_size = int(source.shape[0])

    # Keep z in its native dtype in HBM (no f32 materialization); kernels cast
    # per tile.  Halves the repeatedly re-read zj stream for bf16 inputs.
    z = jnp.concatenate([source, target], axis=0)                    # (N, D)
    n_rows, d = int(z.shape[0]), int(z.shape[1])
    itemsize = jnp.dtype(z.dtype).itemsize

    if use_bf16_gram is None:
        # bf16 MXU operands when inputs are already bf16 (lossless through the
        # f32-accumulating MXU); f32 inputs keep an f32 Gram for accuracy.
        use_bf16_gram = (z.dtype == jnp.bfloat16)

    # ---- stage 1: tiled stats -> bandwidth scalar + per-row squared norms --
    tm_s = _pick_stats_tile(n_rows, d, itemsize)
    bw, sq = pl.pallas_call(
        functools.partial(_mmd_stats_kernel, n_rows=n_rows, n1=int(n1),
                          n2=int(n2), kernel_mul=float(kernel_mul),
                          kernel_num=int(kernel_num)),
        out_shape=(jax.ShapeDtypeStruct((1, 1), jnp.float32),
                   jax.ShapeDtypeStruct((n_rows, 1), jnp.float32)),
        grid_spec=pltpu.PrefetchScalarGridSpec(
            num_scalar_prefetch=0,
            grid=(n_rows // tm_s,),
            in_specs=[pl.BlockSpec((tm_s, d), lambda i: (i, 0))],
            out_specs=[
                pl.BlockSpec((1, 1), lambda i: (0, 0),
                             memory_space=pltpu.MemorySpace.SMEM),
                pl.BlockSpec((tm_s, 1), lambda i: (i, 0)),
            ],
            scratch_shapes=[pltpu.SMEM((1,), jnp.float32),
                            pltpu.VMEM((1, d), jnp.float32)],
        ),
        compiler_params=pltpu.CompilerParams(
            dimension_semantics=("arbitrary",),
            vmem_limit_bytes=_VMEM_LIMIT_BYTES),
    )(z)

    sq_col = sq.reshape(1, n_rows)   # pre-transposed column-side norms

    # ---- stage 2: tiled pairwise-kernel sweep ------------------------------
    tm, tn = _pick_tiles(n_rows, d, itemsize)
    if block_m and n_rows % block_m == 0:
        tm = int(block_m)
    if block_n and n_rows % block_n == 0:
        tn = int(block_n)
    grid = (n_rows // tm, n_rows // tn)

    if d > 2048:
        # Large D: the (tn, D) column DMA approaches per-tile compute time;
        # deepen its pipeline by one buffer.
        zj_spec = pl.BlockSpec((tn, d), lambda i, j: (j, 0),
                               pipeline_mode=pl.Buffered(3))
    else:
        zj_spec = pl.BlockSpec((tn, d), lambda i, j: (j, 0))

    kernel = functools.partial(
        _mmd_tile_kernel,
        batch_size=batch_size, kernel_mul=float(kernel_mul),
        kernel_num=int(kernel_num), tile_m=tm, tile_n=tn,
        use_bf16_gram=bool(use_bf16_gram),
    )

    partials = pl.pallas_call(
        kernel,
        out_shape=jax.ShapeDtypeStruct((grid[0], 8, 128), jnp.float32),
        grid_spec=pltpu.PrefetchScalarGridSpec(
            num_scalar_prefetch=0,
            grid=grid,
            in_specs=[
                pl.BlockSpec((1, 1), lambda i, j: (0, 0),
                             memory_space=pltpu.MemorySpace.SMEM),   # bandwidth
                pl.BlockSpec((tm, 1), lambda i, j: (i, 0)),          # row ||z||^2
                pl.BlockSpec((1, tn), lambda i, j: (0, j)),          # col ||z||^2
                pl.BlockSpec((tm, d), lambda i, j: (i, 0)),          # row tile
                zj_spec,                                             # col tile
            ],
            out_specs=pl.BlockSpec((1, 8, 128), lambda i, j: (i, 0, 0)),
            scratch_shapes=[pltpu.SMEM((4,), jnp.float32)],
        ),
        # Row axis "parallel": per-row-tile partial outputs let both
        # TensorCores (v7x) split the N^2 sweep; column (reduction) axis last.
        compiler_params=pltpu.CompilerParams(
            dimension_semantics=("parallel", "arbitrary"),
            vmem_limit_bytes=_VMEM_LIMIT_BYTES),
    )(bw, sq, sq_col, z, z)

    sums = jnp.sum(partials, axis=(0, 1))            # (128,): lanes 0..3 used
    alpha1 = 1.0 / float(n1 * n1 - n1)
    alpha2 = 1.0 / float(n2 * n2 - n2)
    beta = 1.0 / float(n1 * n2)
    return alpha1 * sums[0] + alpha2 * sums[1] - beta * (sums[2] + sums[3])


def mmd_loss_ref(source, target, *, kernel_mul=2.0, kernel_num=5):
    """Pure-JAX reference mirroring the PyTorch module (for verification)."""
    n1 = source.shape[0]
    n2 = target.shape[0]
    batch_size = n1
    z = jnp.concatenate([source, target], axis=0).astype(jnp.float32)
    diff = z[:, None, :] - z[None, :, :]
    l2 = jnp.sum(diff * diff, axis=-1)
    n_samples = n1 + n2
    bandwidth = jnp.sum(l2) / float(n_samples ** 2 - n_samples)
    bandwidth = bandwidth / (kernel_mul ** (kernel_num // 2))
    kernels = sum(jnp.exp(-l2 / (bandwidth * (kernel_mul ** i)))
                  for i in range(kernel_num))
    alpha1 = 1.0 / (n1 ** 2 - n1)
    alpha2 = 1.0 / (n2 ** 2 - n2)
    beta = 1.0 / (n1 * n2)
    xx = jnp.sum(kernels[:batch_size, :batch_size])
    yy = jnp.sum(kernels[batch_size:, batch_size:])
    xy = jnp.sum(kernels[:batch_size, batch_size:])
    yx = jnp.sum(kernels[batch_size:, :batch_size])
    return alpha1 * xx + alpha2 * yy - beta * (xy + yx)


if __name__ == "__main__":
    key = jax.random.PRNGKey(0)
    k1, k2, k3, k4, k5, k6 = jax.random.split(key, 6)

    # 1) Small case (single tile, typical module usage).
    n1, n2, d = 8, 8, 32
    source = jax.random.normal(k1, (n1, d), dtype=jnp.float32)
    target = jax.random.normal(k2, (n2, d), dtype=jnp.float32) + 0.5
    loss = jax.block_until_ready(mmd_loss(source, target))
    ref = mmd_loss_ref(source, target)
    assert jnp.allclose(loss, ref, rtol=1e-3, atol=1e-4), (loss, ref)

    # 2) Larger case: 2x2 tile grid with the source/target boundary inside a
    #    tile (batch_size=136 with 128-sized tiles) -> exercises both the
    #    uniform fast path and the masked boundary path.
    n1b, n2b, db = 136, 120, 48
    src_b = jax.random.normal(k3, (n1b, db), dtype=jnp.float32)
    tgt_b = jax.random.normal(k4, (n2b, db), dtype=jnp.float32) + 0.25
    loss_b = jax.block_until_ready(
        mmd_loss(src_b, tgt_b, block_m=128, block_n=128))
    ref_b = mmd_loss_ref(src_b, tgt_b)
    assert jnp.allclose(loss_b, ref_b, rtol=1e-3, atol=1e-4), (loss_b, ref_b)

    # 3) bf16 inputs: native-dtype HBM stream + bf16 MXU Gram path.
    n1c, n2c, dc = 128, 128, 64
    src_c = jax.random.normal(k5, (n1c, dc), dtype=jnp.bfloat16)
    tgt_c = (jax.random.normal(k6, (n2c, dc), dtype=jnp.float32) + 0.3
             ).astype(jnp.bfloat16)
    loss_c = jax.block_until_ready(mmd_loss(src_c, tgt_c))
    ref_c = mmd_loss_ref(src_c, tgt_c)
    assert jnp.allclose(loss_c, ref_c, rtol=5e-3, atol=1e-4), (loss_c, ref_c)

    print("KERNEL_OK")
</pallas_src>

<mosaic_0001>
module attributes {stable_mosaic.version = 11 : i64} {
  func.func @_mmd_stats_kernel(%arg0: i32, %arg1: memref<16x32xf32, #tpu.memory_space<vmem>>, %arg2: memref<1x1xf32, #tpu.memory_space<smem>>, %arg3: memref<16x1xf32, #tpu.memory_space<vmem>>, %arg4: memref<1xf32, #tpu.memory_space<smem>>, %arg5: memref<1x32xf32, #tpu.memory_space<vmem>>) attributes {dimension_semantics = [#tpu.dimension_semantics<arbitrary>], iteration_bounds = array<i64: 1>, scalar_prefetch = 0 : i64, scratch_operands = 2 : i64, tpu.core_type = #tpu.core_type<tc>, window_params = [{transform_indices = @transform_0, window_bounds = array<i64: 16, 32>}, {transform_indices = @transform_1, window_bounds = array<i64: 1, 1>}, {transform_indices = @transform_2, window_bounds = array<i64: 16, 1>}]} {
    %c0 = arith.constant 0 : index
    %c0_0 = arith.constant 0 : index
    %0 = vector.load %arg1[%c0, %c0_0] : memref<16x32xf32, #tpu.memory_space<vmem>>, vector<16x32xf32>
    %1 = arith.mulf %0, %0 : vector<16x32xf32>
    %cst = arith.constant dense<0.000000e+00> : vector<16xf32>
    %2 = vector.multi_reduction <add>, %1, %cst [1] : vector<16x32xf32> to vector<16xf32>
    %3 = vector.shape_cast %2 : vector<16xf32> to vector<16x1xf32>
    %c0_1 = arith.constant 0 : index
    %c0_2 = arith.constant 0 : index
    %4 = vector.load %arg3[%c0_1, %c0_2] : memref<16x1xf32, #tpu.memory_space<vmem>>, vector<16x1xf32>
    tpu.vector_store %arg3[%c0_1, %c0_2], %3 {strides = array<i32>} : memref<16x1xf32, #tpu.memory_space<vmem>>, vector<16x1xf32>,
    %c0_i32 = arith.constant 0 : i32
    %5 = arith.cmpi eq, %arg0, %c0_i32 : i32
    %6 = arith.extui %5 : i1 to i32
    %c0_i32_3 = arith.constant 0 : i32
    %7 = arith.cmpi ne, %6, %c0_i32_3 : i32
    scf.if %7 {
      %cst_14 = arith.constant 0.000000e+00 : f32
      %c0_15 = arith.constant 0 : index
      %23 = memref.load %arg4[%c0_15] : memref<1xf32, #tpu.memory_space<smem>>
      memref.store %cst_14, %arg4[%c0_15] : memref<1xf32, #tpu.memory_space<smem>>
      %cst_16 = arith.constant 0.000000e+00 : f32
      %24 = vector.broadcast %cst_16 : f32 to vector<1x32xf32>
      %c0_17 = arith.constant 0 : index
      %c0_18 = arith.constant 0 : index
      %25 = vector.load %arg5[%c0_17, %c0_18] : memref<1x32xf32, #tpu.memory_space<vmem>>, vector<1x32xf32>
      tpu.vector_store %arg5[%c0_17, %c0_18], %24 {strides = array<i32>} : memref<1x32xf32, #tpu.memory_space<vmem>>, vector<1x32xf32>,
    } else {
    }
    %c0_4 = arith.constant 0 : index
    %8 = memref.load %arg4[%c0_4] : memref<1xf32, #tpu.memory_space<smem>>
    %9 = vector.shape_cast %3 : vector<16x1xf32> to vector<1x16x1xf32>
    %cst_5 = arith.constant dense<0.000000e+00> : vector<1xf32>
    %10 = vector.multi_reduction <add>, %9, %cst_5 [1, 2] : vector<1x16x1xf32> to vector<1xf32>
    %11 = vector.shape_cast %10 : vector<1xf32> to vector<1x1x1xf32>
    %12 = vector.extract %11[0, 0, 0] : f32 from vector<1x1x1xf32>
    %13 = arith.addf %8, %12 : f32
    %c0_6 = arith.constant 0 : index
    %14 = memref.load %arg4[%c0_6] : memref<1xf32, #tpu.memory_space<smem>>
    memref.store %13, %arg4[%c0_6] : memref<1xf32, #tpu.memory_space<smem>>
    %c0_7 = arith.constant 0 : index
    %c0_8 = arith.constant 0 : index
    %15 = vector.load %arg5[%c0_7, %c0_8] : memref<1x32xf32, #tpu.memory_space<vmem>>, vector<1x32xf32>
    %cst_9 = arith.constant dense<0.000000e+00> : vector<32xf32>
    %16 = vector.multi_reduction <add>, %0, %cst_9 [0] : vector<16x32xf32> to vector<32xf32>
    %17 = vector.shape_cast %16 : vector<32xf32> to vector<1x32xf32>
    %18 = arith.addf %15, %17 : vector<1x32xf32>
    %c0_10 = arith.constant 0 : index
    %c0_11 = arith.constant 0 : index
    %19 = vector.load %arg5[%c0_10, %c0_11] : memref<1x32xf32, #tpu.memory_space<vmem>>, vector<1x32xf32>
    tpu.vector_store %arg5[%c0_10, %c0_11], %18 {strides = array<i32>} : memref<1x32xf32, #tpu.memory_space<vmem>>, vector<1x32xf32>,
    %c0_i32_12 = arith.constant 0 : i32
    %20 = arith.cmpi eq, %arg0, %c0_i32_12 : i32
    %21 = arith.extui %20 : i1 to i32
    %c0_i32_13 = arith.constant 0 : i32
    %22 = arith.cmpi ne, %21, %c0_i32_13 : i32
    scf.if %22 {
      %c0_14 = arith.constant 0 : index
      %c0_15 = arith.constant 0 : index
      %23 = vector.load %arg5[%c0_14, %c0_15] : memref<1x32xf32, #tpu.memory_space<vmem>>, vector<1x32xf32>
      %c0_16 = arith.constant 0 : index
      %24 = memref.load %arg4[%c0_16] : memref<1xf32, #tpu.memory_space<smem>>
      %cst_17 = arith.constant 3.200000e+01 : f32
      %25 = arith.mulf %cst_17, %24 : f32
      %26 = arith.mulf %23, %23 : vector<1x32xf32>
      %27 = vector.shape_cast %26 : vector<1x32xf32> to vector<1x1x32xf32>
      %cst_18 = arith.constant dense<0.000000e+00> : vector<1xf32>
      %28 = vector.multi_reduction <add>, %27, %cst_18 [1, 2] : vector<1x1x32xf32> to vector<1xf32>
      %29 = vector.shape_cast %28 : vector<1xf32> to vector<1x1x1xf32>
      %30 = vector.extract %29[0, 0, 0] : f32 from vector<1x1x1xf32>
      %cst_19 = arith.constant 2.000000e+00 : f32
      %31 = arith.mulf %cst_19, %30 : f32
      %32 = arith.subf %25, %31 : f32
      %cst_20 = arith.constant 2.400000e+02 : f32
      %33 = arith.divf %32, %cst_20 : f32
      %cst_21 = arith.constant 4.000000e+00 : f32
      %34 = arith.divf %33, %cst_21 : f32
      %cst_22 = arith.constant 9.99999996E-13 : f32
      %35 = arith.maximumf %34, %cst_22 : f32
      %c0_23 = arith.constant 0 : index
      %c0_24 = arith.constant 0 : index
      %36 = memref.load %arg2[%c0_23, %c0_24] : memref<1x1xf32, #tpu.memory_space<smem>>
      memref.store %35, %arg2[%c0_23, %c0_24] : memref<1x1xf32, #tpu.memory_space<smem>>
    } else {
    }
    return
  }
  func.func @transform_0(%arg0: i32) -> (i32, i32) {
    %c0_i32 = arith.constant 0 : i32
    %c0_i32_0 = arith.constant 0 : i32
    return %arg0, %c0_i32 : i32, i32
  }
  func.func @transform_1(%arg0: i32) -> (i32, i32) {
    %c0_i32 = arith.constant 0 : i32
    %c0_i32_0 = arith.constant 0 : i32
    %c0_i32_1 = arith.constant 0 : i32
    return %c0_i32, %c0_i32_0 : i32, i32
  }
  func.func @transform_2(%arg0: i32) -> (i32, i32) {
    %c0_i32 = arith.constant 0 : i32
    %c0_i32_0 = arith.constant 0 : i32
    return %arg0, %c0_i32 : i32, i32
  }
}

</mosaic_0001>

<bundles_post_ra>
// kernel: tpu_custom_call.1
= control target key start
LH: loop header
LB: loop body
LE: loop exit
PB: predicated region body
PF: predicated region fallthrough
CT: control target
= control target key end

     0   :  { %8 = vsyncpa [#allocation5], 0  ;;  %s236_s0 = inlined_call_operand.hbm [shape: f32[16,32], index: 0, kind: input, shape index: {}]   ;;  %s237_s1 = inlined_call_operand.hbm [shape: f32[1,1], index: 1, kind: output, shape index: {0}]   ;;  %s238_s2 = inlined_call_operand.vmem [shape: f32[16,1], index: 2, kind: output, shape index: {1}]  }
   0x1   :  { %9 = vsyncpa [#allocation6], 0  ;;  %s14_s11 = sshll.u32 %s236_s0, 4  ;;  %s198_s12 = smov [#allocation4]   ;;  %s15_s11 = int_to_ptr.hbm [resolvable:$true] %s14_s11 }
   0x2   :  { %s16_s13 = sshll.u32 %s198_s12, 4  ;;  %s199_s14 = smov 128   ;;  %s17_s13 = int_to_ptr.vmem [resolvable:$true] %s16_s13 }
   0x3   :  { %s200_s15 = smov 8  }
   0x4   :  { %22 = dma.hbm_to_vmem [thread:$0]  %s15_s11, 256, %s17_s13, [#allocation5], %s199_s14, %s199_s14, %s200_s15  }
   0x5   :  { %194 = dma.done.wait [#allocation5], 256  }
   0x6   :  { %195 = vsyncadd [#allocation5], 4294967040  ;;  %v27_v0 = vld [vmem:[#allocation4] sm:$0xff]  ;;  %vm31_vm0 = vcmask 261120   ;;  %v28_v1 = vld [vmem:[#allocation4 + $0x8] sm:$0xff]  ;;  %vm47_vm1 = vcmask 253952  }
   0x7   :  { %v29_v2 = vmul.f32 %v27_v0, %v27_v0  ;;  %v66_v3 = vsel %vm31_vm0, %v27_v0, 0.0  ;;  %v67_v4 = vsel %vm31_vm0, %v28_v1, 0.0  ;;  %v30_v7 = vmul.f32 %v28_v1, %v28_v1  ;;  %s123_s28 = sshll.u32 %s237_s1, 4  ;;  %s204_s30 = smov 1e-12   ;;  %s124_s28 = int_to_ptr.hbm [resolvable:$true] %s123_s28 }
   0x8   :  { %v68_v5 = vadd.f32 %v67_v4, %v66_v3  ;;  %v201_v14 = vmov 0.0   ;;  %vm38_vm2 = vcmask 7168   ;;  %v202_v26 = vmov 240.0   ;;  %s205_s4 = smov [#allocation7]  }
   0x9   :  { %v32_v6 = vsel %vm31_vm0, %v29_v2, 0.0  ;;  %v35_v8 = vsel %vm31_vm0, %v30_v7, 0.0  ;;  %48 = vst.msk [vmem:[#allocation3] sm:$0x1] %vm47_vm1, %v201_v14  ;;  %154 = vrcp.f32 %v202_v26  ;;  %v203_v27 = vmov 4.0  }
   0xa   :  { %33 = vadd.xlane.f32.xlu0 %v32_v6  ;;  %v69_v9 = vrot.slane %v68_v5, 4  ;;  %156 = vrcp.f32 %v203_v27 }
   0xc   :  { %v70_v10 = vadd.f32 %v69_v9, %v68_v5 }
   0xe   :  { %v71_v11 = vrot.slane %v70_v10, 2 }
   0xf   :  { %v155_v28 = vpop.eup %154 }
  0x10   :  { %v72_v12 = vadd.f32 %v71_v11, %v70_v10  ;;  %v65_v16 = vld [vmem:[#allocation3] sm:$0x1]  ;;  %v157_v30 = vpop.eup %156  ;;  %v98_v33 = vmul.f32 240.0, %v155_v28  ;;  %vm102_vm3 = vweird.f32 %v155_v28 }
  0x11   :  { %v107_v34 = vmul.f32 4.0, %v157_v30  ;;  %vm111_vm4 = vweird.f32 %v157_v30 }
  0x12   :  { %36 = vadd.xlane.f32.xlu0 %v35_v8  ;;  %v73_v13 = vrot.slane %v72_v12, 1  ;;  %v99_v37 = vsub.f32 1.0, %v98_v33 }
  0x13   :  { %v108_v39 = vsub.f32 1.0, %v107_v34 }
  0x14   :  { %v74_v15 = vadd.f32 %v73_v13, %v72_v12  ;;  %v100_v44 = vmul.f32 %v155_v28, %v99_v37 }
  0x15   :  { %v109_v45 = vmul.f32 %v157_v30, %v108_v39 }
  0x16   :  { %v75_v17 = vadd.f32 %v74_v15, %v65_v16  ;;  %v101_v48 = vadd.f32 %v155_v28, %v100_v44 }
  0x17   :  { %v110_v49 = vadd.f32 %v157_v30, %v109_v45 }
  0x18   :  { %77 = vst.msk [vmem:[#allocation3] sm:$0x1] %vm47_vm1, %v75_v17  ;;  %v103_v52 = vsel %vm102_vm3, %v155_v28, %v101_v48 }
  0x19   :  { %v112_v53 = vsel %vm111_vm4, %v157_v30, %v110_v49 }
  0x1f   :  { %v81_v23 = vld [vmem:[#allocation3] sm:$0x1] }
  0x20   :  { %v84_v24 = vmul.f32 %v81_v23, %v81_v23 }
  0x22   :  { %v85_v25 = vsel %vm47_vm1, %v84_v24, 0.0 }
  0x7d   :  { %v34_v18 = vpop.xlane.xlu0 %33 }
  0x7e   :  { %39 = vst.msk [vmem:[%s238_s2] sm:$0xff] %vm38_vm2, %v34_v18  ;;  %v50_v21 = vsel %vm38_vm2, %v34_v18, 0.0 }
  0x85   :  { %v37_v19 = vpop.xlane.xlu0 %36 }
  0x86   :  { %40 = vst.msk [vmem:[%s238_s2 + $0x8] sm:$0xff] %vm38_vm2, %v37_v19  ;;  %v51_v20 = vsel %vm38_vm2, %v37_v19, 0.0 }
  0x87   :  { %v52_v22 = vadd.f32 %v51_v20, %v50_v21 }
  0x89   :  { %53 = vadd.xlane.f32.xlu1 %v52_v22 }
  0x91   :  { %86 = vadd.xlane.f32.xlu1 %v85_v25 }
  0xfc   :  { %v54_v29 = vpop.xlane.xlu1 %53 }
  0xfd   :  { %v55_v31 = vrot.slane %v54_v29, 4 }
  0xff   :  { %v56_v32 = vadd.f32 %v55_v31, %v54_v29 }
 0x101   :  { %v57_v35 = vrot.slane %v56_v32, 2 }
 0x103   :  { %v58_v36 = vadd.f32 %v57_v35, %v56_v32 }
 0x104   :  { %v87_v38 = vpop.xlane.xlu1 %86 }
 0x105   :  { %v88_v40 = vrot.slane %v87_v38, 4  ;;  %v59_v41 = vrot.slane %v58_v36, 1 }
 0x107   :  { %v89_v42 = vadd.f32 %v88_v40, %v87_v38  ;;  %v60_v43 = vadd.f32 %v59_v41, %v58_v36 }
 0x109   :  { %v90_v46 = vrot.slane %v89_v42, 2  ;;  %138 = vpush %v60_v43 }
 0x10b   :  { %v91_v47 = vadd.f32 %v90_v46, %v89_v42 }
 0x10d   :  { %v92_v50 = vrot.slane %v91_v47, 1 }
 0x10f   :  { %v93_v51 = vadd.f32 %v92_v50, %v91_v47 }
 0x111   :  { %140 = vpush %v93_v51 }
 0x112   :  { %142 = vpush %v103_v52 }
 0x113   :  { %144 = vpush %v112_v53 }
 0x13a   :  { %s139_s2 = spop %138 }
 0x13b   :  { %s83_s19 = smul.f32 32.0, %s139_s2 }
 0x142   :  { %s141_s20 = spop %140 }
 0x143   :  { %s95_s21 = smul.f32 2.0, %s141_s20  ;;  %s143_s22 = spop %142 }
 0x144   :  { %s145_s24 = spop %144 }
 0x145   :  { %s96_s23 = ssub.f32 %s83_s19, %s95_s21 }
 0x147   :  { %s105_s25 = smul.f32 %s143_s22, %s96_s23 }
 0x149   :  { %s114_s29 = smul.f32 %s145_s24, %s105_s25 }
 0x14b   :  { %s115_s3 = smax.f32 %s204_s30, %s114_s29 }
 0x14c   :  { %117 = sst [smem:[#allocation7]] %s115_s3 }
 0x14d   :  { %126 = dma.smem_to_hbm %s205_s4, 16, %s124_s28, [#allocation6]  }
 0x14e   :  { %196 = dma.done.wait [#allocation6], 16  }
 0x14f   :  { %197 = vsyncadd [#allocation6], 4294967280 }
 0x150   :  { %135 = sfence }
 0x151   :  { %136 = vsyncpa [#allocation5], 1 }
 0x152   :  { %137 = vsyncpa [#allocation6], 1 }

</bundles_post_ra>
